<compile_context>
chip_gen: v7x
topology: tpu7x:2x2x1
jax: 0.10.0
libtpu: 0.0.40
codegen_flags: <defaults>
</compile_context>

<pallas_src>
import functools

import jax
import jax.numpy as jnp
from jax import lax
from jax.experimental import pallas as pl
from jax.experimental.pallas import tpu as pltpu


def _tv_kernel(x_ref, out_ref, *, height, width):
    """x_ref: (1, TBC, H*W) lane-dense block.  out_ref: (1, 1, 2) partials."""
    x = x_ref[0].astype(jnp.float32)          # (TBC, H*W)
    hw = height * width

    # Vertical (height) TV: flat[q + W] - flat[q].  A lane pair W apart is
    # always the same column of adjacent rows of the same image -> no mask.
    if height > 1:
        h_sum = jnp.sum(jnp.abs(x[:, width:] - x[:, : hw - width]))
    else:
        h_sum = jnp.float32(0.0)

    # Horizontal (width) TV: flat[q + 1] - flat[q], masked where the pair
    # crosses a row boundary (q % W == W - 1).
    if width > 1:
        w_diff = jnp.abs(x[:, 1:] - x[:, : hw - 1])
        q = lax.broadcasted_iota(jnp.int32, w_diff.shape, 1)
        w_sum = jnp.sum(jnp.where(q % width != width - 1, w_diff, 0.0))
    else:
        w_sum = jnp.float32(0.0)

    # Single merged store of both partial sums: one tiny vst + one writeback
    # DMA per step instead of two separate scalar outputs.
    sel = lax.broadcasted_iota(jnp.int32, (1, 1, 2), 2)
    out_ref[...] = jnp.where(sel == 0, h_sum, w_sum)


def _round_up(v, m):
    return ((v + m - 1) // m) * m


def _vmem_limit_bytes():
    """Request ~3/4 of physical VMEM, capped at 96 MiB (48 MiB on v7x)."""
    cap = 64 * 1024 * 1024
    try:
        cap = int(getattr(pltpu.get_tpu_info(), "vmem_capacity_bytes", cap))
    except Exception:  # defensive: fall back to a v7x-safe limit
        pass
    return min(96 * 1024 * 1024, (cap * 3) // 4)


def _pick_images_per_step(bc, height, width, in_itemsize, vmem_limit_bytes):
    """Largest divisor of bc whose *padded* per-step live set fits the budget,
    capped so the grid keeps at least min(bc, 8) steps."""
    hw_padded = _round_up(max(height * width, 1), 128)    # lane padding
    budget = (vmem_limit_bytes * 3) // 5                  # headroom for compiler scratch
    max_from_grid = max(1, bc // min(bc, 8))              # grid >= min(bc, 8)
    tbc = 1
    for d in range(1, bc + 1):
        if bc % d != 0 or d > max_from_grid:
            continue
        rows = _round_up(d, 8)                            # sublane padding
        # 2x double-buffered input tile + ~6 f32-sized temporaries
        # (cast, shifted slices, diffs, iota mask).
        live = rows * hw_padded * (2 * in_itemsize + 6 * 4)
        if live <= budget:
            tbc = d
    return tbc


def tv_loss(x):
    """Total-variation loss matching the PyTorch TVLoss.forward semantics.

    x: (B, C, H, W) array.
    returns: scalar f32, (h_tv / count_h + w_tv / count_w) / B
    """
    B, C, H, W = x.shape
    bc = B * C
    hw = H * W

    vmem_limit = _vmem_limit_bytes()
    tbc = _pick_images_per_step(bc, H, W, x.dtype.itemsize, vmem_limit)
    grid = bc // tbc

    # Free view of contiguous NCHW: images along sublanes, pixels along lanes.
    x3 = x.reshape(grid, tbc, hw)

    kernel = functools.partial(_tv_kernel, height=H, width=W)

    partials = pl.pallas_call(
        kernel,
        out_shape=jax.ShapeDtypeStruct((grid, 1, 2), jnp.float32),
        grid_spec=pltpu.PrefetchScalarGridSpec(
            num_scalar_prefetch=0,
            grid=(grid,),
            in_specs=[pl.BlockSpec((1, tbc, hw), lambda i: (i, 0, 0))],
            out_specs=pl.BlockSpec((1, 1, 2), lambda i: (i, 0, 0)),
        ),
        compiler_params=pltpu.CompilerParams(
            # Disjoint per-program partials => no cross-step accumulator =>
            # safe to shard the grid across both TensorCores on v7x.
            dimension_semantics=("parallel",),
            vmem_limit_bytes=vmem_limit,
        ),
    )(x3)

    h_tv = jnp.sum(partials[:, 0, 0])
    w_tv = jnp.sum(partials[:, 0, 1])

    count_h = jnp.float32(C * (H - 1) * W)   # _tensor_size(x[:, :, 1:, :])
    count_w = jnp.float32(C * H * (W - 1))   # _tensor_size(x[:, :, :, 1:])

    return (h_tv / count_h + w_tv / count_w) / jnp.float32(B)


def _tv_loss_ref(x):
    """Pure-JAX reference mirroring the PyTorch implementation."""
    B, C, H, W = x.shape
    count_h = C * (H - 1) * W
    count_w = C * H * (W - 1)
    h_tv = jnp.sum(jnp.abs(x[:, :, 1:, :] - x[:, :, : H - 1, :]))
    w_tv = jnp.sum(jnp.abs(x[:, :, :, 1:] - x[:, :, :, : W - 1]))
    return (h_tv / count_h + w_tv / count_w) / B


if __name__ == "__main__":
    key = jax.random.PRNGKey(0)
    B, C, H, W = 2, 4, 16, 16
    x = jax.random.normal(key, (B, C, H, W), dtype=jnp.float32)

    out = tv_loss(x)
    out = jax.block_until_ready(out)

    ref = _tv_loss_ref(x)
    assert jnp.allclose(out, ref, rtol=1e-5, atol=1e-5), (out, ref)

    print("KERNEL_OK")
</pallas_src>

<mosaic_0001>
module attributes {stable_mosaic.version = 11 : i64} {
  func.func @_tv_kernel(%arg0: i32, %arg1: memref<1x1x256xf32, #tpu.memory_space<vmem>>, %arg2: memref<1x1x2xf32, #tpu.memory_space<vmem>>) attributes {dimension_semantics = [#tpu.dimension_semantics<parallel>], iteration_bounds = array<i64: 8>, scalar_prefetch = 0 : i64, scratch_operands = 0 : i64, tpu.core_type = #tpu.core_type<tc>, window_params = [{transform_indices = @transform_0, window_bounds = array<i64: 1, 1, 256>}, {transform_indices = @transform_1, window_bounds = array<i64: 1, 1, 2>}]} {
    %c0 = arith.constant 0 : index
    %c0_0 = arith.constant 0 : index
    %c0_1 = arith.constant 0 : index
    %0 = vector.load %arg1[%c0, %c0_0, %c0_1] : memref<1x1x256xf32, #tpu.memory_space<vmem>>, vector<1x1x256xf32>
    %1 = vector.shape_cast %0 : vector<1x1x256xf32> to vector<1x256xf32>
    %2 = vector.extract_strided_slice %1 {offsets = [0, 16], sizes = [1, 240], strides = [1, 1]} : vector<1x256xf32> to vector<1x240xf32>
    %3 = vector.extract_strided_slice %1 {offsets = [0, 0], sizes = [1, 240], strides = [1, 1]} : vector<1x256xf32> to vector<1x240xf32>
    %4 = arith.subf %2, %3 : vector<1x240xf32>
    %5 = math.absf %4 : vector<1x240xf32>
    %6 = vector.shape_cast %5 : vector<1x240xf32> to vector<1x1x240xf32>
    %cst = arith.constant dense<0.000000e+00> : vector<1xf32>
    %7 = vector.multi_reduction <add>, %6, %cst [1, 2] : vector<1x1x240xf32> to vector<1xf32>
    %8 = vector.shape_cast %7 : vector<1xf32> to vector<1x1x1xf32>
    %9 = vector.extract %8[0, 0, 0] : f32 from vector<1x1x1xf32>
    %10 = vector.extract_strided_slice %1 {offsets = [0, 1], sizes = [1, 255], strides = [1, 1]} : vector<1x256xf32> to vector<1x255xf32>
    %11 = vector.extract_strided_slice %1 {offsets = [0, 0], sizes = [1, 255], strides = [1, 1]} : vector<1x256xf32> to vector<1x255xf32>
    %12 = arith.subf %10, %11 : vector<1x255xf32>
    %13 = math.absf %12 : vector<1x255xf32>
    %14 = tpu.iota {dimensions = array<i32: 1>} : vector<1x255xi32>
    %c16_i32 = arith.constant 16 : i32
    %c0_i32 = arith.constant 0 : i32
    %15 = arith.cmpi eq, %c16_i32, %c0_i32 : i32
    %c1_i32 = arith.constant 1 : i32
    %16 = arith.select %15, %c1_i32, %c16_i32 : i32
    %17 = vector.broadcast %16 : i32 to vector<1x255xi32>
    %18 = arith.remsi %14, %17 : vector<1x255xi32>
    %c0_i32_2 = arith.constant 0 : i32
    %19 = vector.broadcast %c0_i32_2 : i32 to vector<1x255xi32>
    %20 = arith.cmpi ne, %18, %19 : vector<1x255xi32>
    %c0_i32_3 = arith.constant 0 : i32
    %21 = vector.broadcast %c0_i32_3 : i32 to vector<1x255xi32>
    %22 = arith.cmpi slt, %18, %21 : vector<1x255xi32>
    %c0_i32_4 = arith.constant 0 : i32
    %23 = arith.cmpi slt, %16, %c0_i32_4 : i32
    %24 = vector.broadcast %23 : i1 to vector<1x255xi1>
    %25 = vector.broadcast %24 : vector<1x255xi1> to vector<1x255xi1>
    %26 = arith.xori %22, %25 : vector<1x255xi1>
    %27 = arith.andi %26, %20 : vector<1x255xi1>
    %28 = vector.broadcast %16 : i32 to vector<1x255xi32>
    %29 = arith.addi %18, %28 : vector<1x255xi32>
    %30 = arith.select %27, %29, %18 : vector<1x255xi1>, vector<1x255xi32>
    %c15_i32 = arith.constant 15 : i32
    %31 = vector.broadcast %c15_i32 : i32 to vector<1x255xi32>
    %32 = arith.cmpi ne, %30, %31 : vector<1x255xi32>
    %cst_5 = arith.constant 0.000000e+00 : f32
    %33 = vector.broadcast %cst_5 : f32 to vector<1x255xf32>
    %34 = arith.select %32, %13, %33 : vector<1x255xi1>, vector<1x255xf32>
    %35 = vector.shape_cast %34 : vector<1x255xf32> to vector<1x1x255xf32>
    %cst_6 = arith.constant dense<0.000000e+00> : vector<1xf32>
    %36 = vector.multi_reduction <add>, %35, %cst_6 [1, 2] : vector<1x1x255xf32> to vector<1xf32>
    %37 = vector.shape_cast %36 : vector<1xf32> to vector<1x1x1xf32>
    %38 = vector.extract %37[0, 0, 0] : f32 from vector<1x1x1xf32>
    %39 = tpu.iota {dimensions = array<i32: 2>} : vector<1x1x2xi32>
    %c0_i32_7 = arith.constant 0 : i32
    %40 = vector.broadcast %c0_i32_7 : i32 to vector<1x1x2xi32>
    %41 = arith.cmpi eq, %39, %40 : vector<1x1x2xi32>
    %42 = vector.broadcast %9 : f32 to vector<1x1x2xf32>
    %43 = vector.broadcast %38 : f32 to vector<1x1x2xf32>
    %44 = arith.select %41, %42, %43 : vector<1x1x2xi1>, vector<1x1x2xf32>
    %c0_8 = arith.constant 0 : index
    %c0_9 = arith.constant 0 : index
    %c0_10 = arith.constant 0 : index
    %45 = vector.load %arg2[%c0_8, %c0_9, %c0_10] : memref<1x1x2xf32, #tpu.memory_space<vmem>>, vector<1x1x2xf32>
    tpu.vector_store %arg2[%c0_8, %c0_9, %c0_10], %44 {strides = array<i32>} : memref<1x1x2xf32, #tpu.memory_space<vmem>>, vector<1x1x2xf32>,
    return
  }
  func.func @transform_0(%arg0: i32) -> (i32, i32, i32) {
    %c0_i32 = arith.constant 0 : i32
    %c0_i32_0 = arith.constant 0 : i32
    %c0_i32_1 = arith.constant 0 : i32
    return %arg0, %c0_i32, %c0_i32_0 : i32, i32, i32
  }
  func.func @transform_1(%arg0: i32) -> (i32, i32, i32) {
    %c0_i32 = arith.constant 0 : i32
    %c0_i32_0 = arith.constant 0 : i32
    %c0_i32_1 = arith.constant 0 : i32
    return %arg0, %c0_i32, %c0_i32_0 : i32, i32, i32
  }
}

</mosaic_0001>

<bundles_post_ra>
// kernel: tpu_custom_call.1
= control target key start
LH: loop header
LB: loop body
LE: loop exit
PB: predicated region body
PF: predicated region fallthrough
CT: control target
= control target key end

     0   :  { %6 = vsyncpa [#allocation3], 0  ;;  %s552_s0 = inlined_call_operand.hbm [shape: f32[8,1,256], index: 0, kind: input, shape index: {}]   ;;  %s553_s1 = inlined_call_operand.vmem [shape: f32[8,1,2], index: 1, kind: output, shape index: {}]  }
   0x1   :  { %8 = vsyncpa [#allocation3 + $0x1], 0  ;;  %s445_s6 = smov 0   ;;  %s447_s7 = smov 0  }
   0x2   :  { %s449_s8 = smov 0   ;;  %s451_s9 = smov 0  }
   0x3 LB: > { %s464_s10 = sadd.s32 4294967295, %s428_s9   ;;  %s467_s11 = sadd.s32 1, %s428_s9   ;;  %s428_s9 = sphi %s451_s9, %s561_s9   ;;  %s424_s8 = sphi %s449_s8, %s560_s8   ;;  %s420_s7 = sphi %s447_s7, %s559_s7   ;;  %s416_s6 = sphi %s445_s6, %s558_s6  }
   0x4   : > { %s18_s12 = ssub.s32 %s428_s9, %s467_s11  ;;  %s21_s13 = sadd.s32 1, %s424_s8 }
   0x5   : > { %p19_p0 = scmp.eq.s32.totalorder %s18_s12, 0  ;;  %p28_p1 = scmp.ne.s32.totalorder %s424_s8, %s420_s7 }
   0x6   : > { %p29_p2 = scmp.eq.s32.totalorder %s428_s9, 0  ;;  %p34_p3 = scmp.ne.s32.totalorder %s420_s7, %s416_s6 }
   0x7   : > { %s477_s14 = scalar_select %p19_p0, %s424_s8, %s21_s13  }
   0x8   : > { %p30_p4 = por %p29_p2, %p28_p1  ;;  %p35_p5 = scmp.eq.s32.totalorder %s464_s10, 0 }
   0x9   : > { %p327_p6 = scmp.lt.s32.totalorder %s428_s9, 8  ;;  %s84_s16 = sand.u32 1, %s424_s8  }
   0xa   : > { %p481_p7 = por %p35_p5, %p34_p3  ;;  %s309_s17 = sshll.u32 %s84_s16, 1 }
   0xb   : > { %s316_s18 = sshll.u32 %s428_s9, 5  ;;  %s88_s22 = scalar_lea.vmem [#allocation2], %s309_s17 }
   0xc   : > { %s490_s21 = scalar_lea.hbm %s552_s0, %s316_s18  ;;  %s96_s23 = sshll.u32 %s88_s22, 4  ;;  %s492_s23 = int_to_ptr.vmem [resolvable:$true] %s96_s23 }
   0xd   : > { %p494_p8 = pnand %p327_p6, %p30_p4  ;;  %s85_s25 = scalar_lea.sflag [#allocation3], %s84_s16 }
   0xe   : > { %s364_s26 = scalar_lea.hbm %s490_s21, 32  ;;  %s369_s29 = scalar_lea.hbm %s552_s0, 256 }
   0xf   : > { %p365_p11 = scmp.ne.s32.totalorder %s490_s21, %s364_s26  ;;  %p366_p12 = pneg %p494_p8 }
  0x10   : > { %p370_p1 = scmp.lt.u32.totalorder %s490_s21, %s552_s0  ;;  %p371_p2 = scmp.lt.u32.totalorder %s369_s29, %s364_s26 }
  0x11   : > { %p367_p13 = pnand %p366_p12, %p365_p11  ;;  %p373_p4 = scmp.lt.u32.totalorder %s364_s26, %s490_s21 }
  0x12   : > { %p372_p3 = por %p371_p2, %p370_p1 }
  0x13   : > { %p368_p0 = pneg %p367_p13 }
  0x14   : > { %p374_p5 = por %p373_p4, %p372_p3 }
  0x16   : > { %p375_p6 = pnand %p374_p5, %p368_p0 }
  0x18   : > { %378 = shalt.err (!%p375_p6)
}
  0x19   : > { %s379_s3 = scalar_lea.vmem %s492_s23, 32  ;;  %s430_s4 = smov [#allocation2]  }
  0x1a   : > { %p380_p11 = scmp.ne.s32.totalorder %s492_s23, %s379_s3  ;;  %s384_s5 = sshll.u32 %s430_s4, 4  ;;  %s385_s5 = int_to_ptr.vmem [resolvable:$false] %s384_s5 }
  0x1b   : > { %s386_s6 = scalar_lea.vmem %s385_s5, 64  ;;  %p387_p10 = scmp.lt.s32.totalorder %s492_s23, %s385_s5 }
  0x1c   : > { %p382_p13 = pnand %p380_p11, %p366_p12  ;;  %p388_p1 = scmp.lt.s32.totalorder %s386_s6, %s379_s3 }
  0x1e   : > { %p383_p9 = pneg %p382_p13  ;;  %p389_p2 = por %p388_p1, %p387_p10 }
  0x20   : > { %p390_p3 = pnand %p389_p2, %p383_p9 }
  0x22   : > { %393 = shalt.err (!%p390_p3)
}
  0x23   : > { %326 = dma.hbm_to_vmem [thread:$0]  (!%p494_p8), %s490_s21, 32, %s492_s23, %s85_s25  }
  0x24   : > { %p556_p0 = scmp.lt.s32.totalorder %s428_s9, 9  ;;  %p557_p4 = scmp.ge.s32.totalorder %s428_s9, 1 }
  0x26   : > { %p102_p12 = pnand %p557_p4, %p556_p0 }
  0x27   : > { %s107_s12 = sand.u32 (!%p102_p12), 1, %s420_s7  }
  0x28   : > { %105 = sbr.rel (%p102_p12) target bundleno = 508 (0x1fc), region = 24  ;;  %s313_s13 = sshll.u32 (!%p102_p12), %s107_s12, 1 }
  0x29   : > { %s108_s16 = scalar_lea.sflag (!%p102_p12), [#allocation3], %s107_s12  ;;  %s111_s17 = scalar_lea.vmem (!%p102_p12), [#allocation2], %s313_s13 }
  0x2f   : > { %411 = dma.done.wait (%p481_p7), %s108_s16, 32  }
  0x30   : > { %413 = vsyncadd (%p481_p7), %s108_s16, 4294967264  ;;  %v131_v0 = vld [vmem:[%s111_s17] sm:$0x3]  ;;  %s431_s18 = smov 1   ;;  %s432_s19 = smov 16   ;;  %v142_v1 = vlaneseq  ;;  %vm175_vm0 = vcmask 7168  }
  0x31   : > { %172 = vrot.lane.b32.xlu0 %v131_v0, %s431_s18  ;;  %vm136_vm1 = vcmask 130048   ;;  %s433_s9 = smov 127   ;;  %s434_s15 = smov 112   ;;  %vm222_vm3 = vcmask 1039360   ;;  %vm229_vm5 = vcmask 1032192   ;;  %vm158_vm6 = vcmask 1040384  }
  0x32   : > { %v143_v3 = vshrl.u32 %v142_v1, 7  ;;  %v181_v19 = vand.u32 127, %v142_v1  ;;  %vm154_vm7 = vcmask 916480   ;;  %vm160_vm8 = vcmask 909312   ;;  %p128_p7 = scmp.lt.s32.totalorder %s464_s10, 7 }
  0x33   : > { %vm245_vm10 = vcmask 8192  }
  0x34   : > { %v144_v8 = vsub.s32 0, %v143_v3  ;;  %v148_v14 = vsub.s32 1, %v143_v3  ;;  %v182_v20 = vadd.s32 128, %v181_v19  ;;  %v187_v22 = vand.u32 15, %v181_v19  ;;  %s563_s10 = smov (!%p128_p7, %s464_s10), 7 }
  0x35   : > { %133 = vrot.lane.b32.xlu0 %v131_v0, %s432_s19  ;;  %vm241_vm9 = vcmp.eq.s32.totalorder %v181_v19, 0  ;;  %s130_s23 = scalar_lea.vmem %s553_s1, %s563_s10 }
  0x36   : > { %v194_v21 = vand.u32 15, %v182_v20  ;;  %vm207_vm4 = vcmp.ne.s32.totalorder %v187_v22, 15 }
  0x38   : > { %vm208_vm2 = vcmp.ne.s32.totalorder %v194_v21, 15 }
  0xa3   : > { %v173_v2 = vpop.permute.xlu0 %172 }
  0xa4   : > { %v174_v4 = vrot.slane %v173_v2, 7 }
  0xa6   : > { %v176_v5 = vsel %vm175_vm0, %v174_v4, %v173_v2 }
  0xa7   : > { %v178_v6 = vsub.f32 %v131_v0, %v176_v5  ;;  %v134_v7 = vpop.permute.xlu0 %133 }
  0xa8   : > { %v135_v9 = vrot.slane %v134_v7, 7 }
  0xa9   : > { %v179_v10 = vand.u32 2147483647, %v178_v6 }
  0xaa   : > { %v137_v11 = vsel %vm136_vm1, %v135_v9, %v134_v7 }
  0xab   : > { %v139_v12 = vsub.f32 %v131_v0, %v137_v11  ;;  %v213_v13 = vrot.slane %v179_v10, %v144_v8  ;;  %v217_v16 = vrot.slane %v179_v10, %v148_v14 }
  0xad   : > { %v140_v15 = vand.u32 2147483647, %v139_v12  ;;  %218 = vrot.lane.b32.xlu1 %v213_v13, %s433_s9 }
  0xaf   : > { %v145_v17 = vrot.slane %v140_v15, %v144_v8  ;;  %v149_v18 = vrot.slane %v140_v15, %v148_v14 }
  0xb1   : > { %220 = vrot.lane.b32.xlu1 %v217_v16, %s433_s9  ;;  %150 = vrot.lane.b32.xlu0 %v145_v17, %s434_s15 }
  0xb5   : > { %152 = vrot.lane.b32.xlu1 %v149_v18, %s434_s15 }
 0x11f   : > { %v219_v23 = vpop.permute.xlu1 %218 }
 0x123   : > { %v221_v24 = vpop.permute.xlu1 %220  ;;  %v151_v30 = vpop.permute.xlu0 %150 }
 0x124   : > { %v223_v25 = vsel %vm222_vm3, %v219_v23, %v221_v24  ;;  %v227_v26 = vsel %vm208_vm2, %v221_v24, 0.0 }
 0x125   : > { %v226_v27 = vsel %vm207_vm4, %v223_v25, 0.0  ;;  %v230_v28 = vsel %vm229_vm5, %v227_v26, 0.0 }
 0x126   : > { %v228_v29 = vsel %vm158_vm6, %v226_v27, 0.0 }
 0x127   : > { %v153_v31 = vpop.permute.xlu1 %152  ;;  %v231_v32 = vadd.f32 %v230_v28, %v228_v29 }
 0x128   : > { %v155_v33 = vsel %vm154_vm7, %v151_v30, %v153_v31  ;;  %v161_v34 = vsel %vm160_vm8, %v153_v31, 0.0 }
 0x129   : > { %232 = vadd.xlane.f32.xlu1 %v231_v32  ;;  %v159_v35 = vsel %vm158_vm6, %v155_v33, 0.0 }
 0x12a   : > { %v162_v36 = vadd.f32 %v161_v34, %v159_v35 }
 0x12c   : > { %163 = vadd.xlane.f32.xlu0 %v162_v36 }
 0x1b6   : > { %v233_v37 = vpop.xlane.xlu1 %232 }
 0x1b7   : > { %v234_v38 = vrot.slane %v233_v37, 4 }
 0x1b9   : > { %v235_v39 = vadd.f32 %v234_v38, %v233_v37  ;;  %v164_v40 = vpop.xlane.xlu0 %163 }
 0x1ba   : > { %v165_v41 = vrot.slane %v164_v40, 4 }
 0x1bb   : > { %v236_v42 = vrot.slane %v235_v39, 2 }
 0x1bc   : > { %v166_v43 = vadd.f32 %v165_v41, %v164_v40 }
 0x1bd   : > { %v237_v44 = vadd.f32 %v236_v42, %v235_v39 }
 0x1be   : > { %v167_v45 = vrot.slane %v166_v43, 2 }
 0x1bf   : > { %v238_v47 = vrot.slane %v237_v44, 1 }
 0x1c0   : > { %v168_v46 = vadd.f32 %v167_v45, %v166_v43 }
 0x1c1   : > { %v239_v50 = vadd.f32 %v238_v47, %v237_v44 }
 0x1c2   : > { %v169_v48 = vrot.slane %v168_v46, 1 }
 0x1c4   : > { %v170_v49 = vadd.f32 %v169_v48, %v168_v46 }
 0x1c6   : > { %317 = vpush %v170_v49 }
 0x1c7   : > { %319 = vpush %v239_v50 }
 0x1f7   : > { %s318_s20 = spop %317 }
 0x1f8   : > { %v242_v51 = vstv %s318_s20  ;;  %s320_s24 = spop %319 }
 0x1f9   : > { %v243_v52 = vstv %s320_s24 }
 0x1fa   : > { %v244_v53 = vsel %vm241_vm9, %v242_v51, %v243_v52 }
 0x1fb   : > { %246 = vst.msk [vmem:[%s130_s23] sm:$0x1] %vm245_vm10, %v244_v53 }
 0x1fc PF: > { %p11_p8 = scmp.ge.s32.totalorder %s467_s11, 10   ;;  %s558_s6 = smov %s420_s7 }
 0x1fd   : > { %s559_s7 = smov %s424_s8  ;;  %s560_s8 = smov %s477_s14 }
 0x1fe   : > { %s561_s9 = smov %s467_s11  ;;  %13 = sbr.rel (!%p11_p8) target bundleno = 3 (0x3), region = 64 }
 0x205   :  { %264 = vsyncpa [#allocation3], 1 }
 0x206   :  { %266 = vsyncpa [#allocation3 + $0x1], 1 }

</bundles_post_ra>
